<compile_context>
chip_gen: v6e
topology: v6e:2x2x1
jax: 0.10.0
libtpu: 0.0.40
codegen_flags: <defaults>
</compile_context>

<pallas_src>
import functools

import jax
import jax.numpy as jnp
from jax.experimental import pallas as pl
from jax.experimental.pallas import tpu as pltpu


# ---------------------------------------------------------------------------
# Pallas kernel
# ---------------------------------------------------------------------------

def _bn_act_kernel(x_ref, s_ref, b_ref, o_ref, *, act):
    # x_ref: (tr, tc) activation tile; rows = (batch, channel) pairs,
    #        cols = flattened T*H*W (lane-dense).
    # s_ref/b_ref: (tr, 1) per-row BN scale / shift (f32), lane-broadcast by VPU.
    x = x_ref[...].astype(jnp.float32)
    y = x * s_ref[...] + b_ref[...]
    if act == "relu":
        y = jnp.maximum(y, 0.0)
    elif act == "silu":
        y = y * jax.nn.sigmoid(y)
    elif act == "sigmoid":
        y = jax.nn.sigmoid(y)
    # act == "none": identity
    o_ref[...] = y.astype(o_ref.dtype)


def _pick_tile(dim, pref, align):
    """Largest tile <= pref that is `align`-aligned, or the full dim if small."""
    if dim <= pref:
        return dim
    return max(align, (pref // align) * align)


def batch_norm_act(x, gamma, beta, running_mean, running_var,
                   eps=1e-5, act="relu"):
    """Fused eval-mode BatchNorm3d (or any NC... BN) + activation.

    x: (B, C, *spatial)  -- PyTorch NCDHW layout.
    gamma/beta/running_mean/running_var: (C,)
    act: "relu" | "silu" | "sigmoid" | "none"
    """
    B, C = int(x.shape[0]), int(x.shape[1])
    spatial = x.shape[2:]
    M = 1
    for d in spatial:
        M *= int(d)
    rows = B * C

    # Fold BN running stats into per-channel scale / shift (f32).
    gamma = jnp.asarray(gamma, jnp.float32)
    beta = jnp.asarray(beta, jnp.float32)
    mean = jnp.asarray(running_mean, jnp.float32)
    var = jnp.asarray(running_var, jnp.float32)
    scale = gamma * jax.lax.rsqrt(var + eps)
    shift = beta - mean * scale

    # Row r = b*C + c  ->  channel c.  Per-row scale/shift, shape (rows, 1).
    s_rows = jnp.tile(scale, B).reshape(rows, 1)
    b_rows = jnp.tile(shift, B).reshape(rows, 1)

    # Channels stay off the lane dim; flattened spatial is the lane-dense axis.
    x2 = x.reshape(rows, M)

    # Tile selection: sublane-aligned rows, lane-aligned (multiple of 128) cols.
    # Target ~2 MiB (f32) / ~4 MiB-equivalent (bf16) per activation tile so
    # double-buffered in+out stays well under the scoped-VMEM limit while the
    # per-step pipeline overhead is negligible.
    itemsize = jnp.dtype(x.dtype).itemsize
    pref_cols = 4096 if itemsize <= 2 else 2048
    tr = _pick_tile(rows, 256, 8)
    tc = _pick_tile(M, pref_cols, 128)
    grid = (pl.cdiv(rows, tr), pl.cdiv(M, tc))

    kern = functools.partial(_bn_act_kernel, act=act)
    out2 = pl.pallas_call(
        kern,
        out_shape=jax.ShapeDtypeStruct((rows, M), x.dtype),
        grid=grid,
        in_specs=[
            pl.BlockSpec((tr, tc), lambda i, j: (i, j)),
            pl.BlockSpec((tr, 1), lambda i, j: (i, 0)),
            pl.BlockSpec((tr, 1), lambda i, j: (i, 0)),
        ],
        out_specs=pl.BlockSpec((tr, tc), lambda i, j: (i, j)),
        compiler_params=pltpu.CompilerParams(
            dimension_semantics=("parallel", "parallel"),
            vmem_limit_bytes=64 << 20),
    )(x2, s_rows, b_rows)

    return out2.reshape(x.shape)


# ---------------------------------------------------------------------------
# Reference (pure JAX) for verification
# ---------------------------------------------------------------------------

def batch_norm_act_ref(x, gamma, beta, mean, var, eps=1e-5, act="relu"):
    shape = (1, -1) + (1,) * (x.ndim - 2)
    scale = (gamma / jnp.sqrt(var + eps)).reshape(shape)
    shift = (beta - mean * gamma / jnp.sqrt(var + eps)).reshape(shape)
    y = x.astype(jnp.float32) * scale + shift
    if act == "relu":
        y = jnp.maximum(y, 0.0)
    elif act == "silu":
        y = y * jax.nn.sigmoid(y)
    elif act == "sigmoid":
        y = jax.nn.sigmoid(y)
    return y.astype(x.dtype)


# ---------------------------------------------------------------------------

if __name__ == "__main__":
    key = jax.random.PRNGKey(0)
    kx, kg, kb, km, kv = jax.random.split(key, 5)

    B, C, T, H, W = 2, 4, 8, 16, 16          # BatchNorm3d input: (B, C, D, H, W)
    x = jax.random.normal(kx, (B, C, T, H, W), jnp.float32)

    # Synthetic (eval-mode) BN parameters / running statistics.
    gamma = jax.random.uniform(kg, (C,), jnp.float32, 0.5, 1.5)
    beta = 0.1 * jax.random.normal(kb, (C,), jnp.float32)
    running_mean = 0.1 * jax.random.normal(km, (C,), jnp.float32)
    running_var = jax.random.uniform(kv, (C,), jnp.float32, 0.5, 1.5)

    fwd = jax.jit(functools.partial(batch_norm_act, eps=1e-5, act="relu"))
    out = jax.block_until_ready(fwd(x, gamma, beta, running_mean, running_var))

    ref = batch_norm_act_ref(x, gamma, beta, running_mean, running_var, act="relu")
    assert out.shape == x.shape, out.shape
    assert bool(jnp.all(jnp.isfinite(out)))
    assert bool(jnp.all(out >= 0.0))                         # ReLU output
    assert bool(jnp.allclose(out, ref, atol=1e-5, rtol=1e-5))

    # apply_act=False path (Identity activation).
    fwd_id = jax.jit(functools.partial(batch_norm_act, eps=1e-5, act="none"))
    out_id = jax.block_until_ready(fwd_id(x, gamma, beta, running_mean, running_var))
    ref_id = batch_norm_act_ref(x, gamma, beta, running_mean, running_var, act="none")
    assert bool(jnp.allclose(out_id, ref_id, atol=1e-5, rtol=1e-5))

    # bf16 transport (f32 BN math inside the kernel).
    x_bf16 = x.astype(jnp.bfloat16)
    out_bf = jax.block_until_ready(fwd(x_bf16, gamma, beta, running_mean, running_var))
    ref_bf = batch_norm_act_ref(x_bf16, gamma, beta, running_mean, running_var, act="relu")
    assert out_bf.dtype == jnp.bfloat16
    assert bool(jnp.allclose(out_bf.astype(jnp.float32),
                             ref_bf.astype(jnp.float32), atol=3e-2, rtol=3e-2))

    # Non-128-multiple spatial size (exercises edge-tile masking).
    x_odd = jax.random.normal(kx, (B, C, 3, 5, 7), jnp.float32)
    out_odd = jax.block_until_ready(fwd(x_odd, gamma, beta, running_mean, running_var))
    ref_odd = batch_norm_act_ref(x_odd, gamma, beta, running_mean, running_var, act="relu")
    assert bool(jnp.allclose(out_odd, ref_odd, atol=1e-5, rtol=1e-5))

    print("KERNEL_OK")
</pallas_src>

<mosaic_0001>
module attributes {stable_mosaic.version = 11 : i64} {
  func.func @_bn_act_kernel(%arg0: i32, %arg1: i32, %arg2: memref<8x2048xf32, #tpu.memory_space<vmem>>, %arg3: memref<8x1xf32, #tpu.memory_space<vmem>>, %arg4: memref<8x1xf32, #tpu.memory_space<vmem>>, %arg5: memref<8x2048xf32, #tpu.memory_space<vmem>>) attributes {dimension_semantics = [#tpu.dimension_semantics<parallel>, #tpu.dimension_semantics<parallel>], iteration_bounds = array<i64: 1, 1>, scalar_prefetch = 0 : i64, scratch_operands = 0 : i64, tpu.core_type = #tpu.core_type<tc>, window_params = [{transform_indices = @transform_0, window_bounds = array<i64: 8, 2048>}, {transform_indices = @transform_1, window_bounds = array<i64: 8, 1>}, {transform_indices = @transform_2, window_bounds = array<i64: 8, 1>}, {transform_indices = @transform_3, window_bounds = array<i64: 8, 2048>}]} {
    %c0 = arith.constant 0 : index
    %c0_0 = arith.constant 0 : index
    %0 = vector.load %arg2[%c0, %c0_0] : memref<8x2048xf32, #tpu.memory_space<vmem>>, vector<8x2048xf32>
    %c0_1 = arith.constant 0 : index
    %c0_2 = arith.constant 0 : index
    %1 = vector.load %arg3[%c0_1, %c0_2] : memref<8x1xf32, #tpu.memory_space<vmem>>, vector<8x1xf32>
    %2 = vector.broadcast %1 : vector<8x1xf32> to vector<8x2048xf32>
    %3 = arith.mulf %0, %2 : vector<8x2048xf32>
    %c0_3 = arith.constant 0 : index
    %c0_4 = arith.constant 0 : index
    %4 = vector.load %arg4[%c0_3, %c0_4] : memref<8x1xf32, #tpu.memory_space<vmem>>, vector<8x1xf32>
    %5 = vector.broadcast %4 : vector<8x1xf32> to vector<8x2048xf32>
    %6 = arith.addf %3, %5 : vector<8x2048xf32>
    %cst = arith.constant 0.000000e+00 : f32
    %7 = vector.broadcast %cst : f32 to vector<8x2048xf32>
    %8 = arith.maximumf %6, %7 : vector<8x2048xf32>
    %c0_5 = arith.constant 0 : index
    %c0_6 = arith.constant 0 : index
    %9 = vector.load %arg5[%c0_5, %c0_6] : memref<8x2048xf32, #tpu.memory_space<vmem>>, vector<8x2048xf32>
    tpu.vector_store %arg5[%c0_5, %c0_6], %8 {strides = array<i32>} : memref<8x2048xf32, #tpu.memory_space<vmem>>, vector<8x2048xf32>,
    return
  }
  func.func @transform_0(%arg0: i32, %arg1: i32) -> (i32, i32) {
    %c0_i32 = arith.constant 0 : i32
    return %arg0, %arg1 : i32, i32
  }
  func.func @transform_1(%arg0: i32, %arg1: i32) -> (i32, i32) {
    %c0_i32 = arith.constant 0 : i32
    %c0_i32_0 = arith.constant 0 : i32
    return %arg0, %c0_i32 : i32, i32
  }
  func.func @transform_2(%arg0: i32, %arg1: i32) -> (i32, i32) {
    %c0_i32 = arith.constant 0 : i32
    %c0_i32_0 = arith.constant 0 : i32
    return %arg0, %c0_i32 : i32, i32
  }
  func.func @transform_3(%arg0: i32, %arg1: i32) -> (i32, i32) {
    %c0_i32 = arith.constant 0 : i32
    return %arg0, %arg1 : i32, i32
  }
}

</mosaic_0001>

<bundles_post_ra>
// kernel: tile.0
= control target key start
LH: loop header
LB: loop body
LE: loop exit
PB: predicated region body
PF: predicated region fallthrough
CT: control target
= control target key end

     0   :  { %s35_s8 = smov 125   ;;  %vm8_vm0 = vcmask 7168   ;;  %s36_s11 = smov 126   ;;  %s62_s0 = inlined_call_operand.vmem [shape: f32[2,4], index: 0, kind: input, shape index: {}]   ;;  %s63_s1 = inlined_call_operand.vmem [shape: f32[8,1], index: 1, kind: output, shape index: {}]  }
   0x1   :  { %v5_v0 = vld [vmem:[%s62_s0] sm:$0x3]  ;;  %s34_s0 = smov 127  }
   0x2   :  { %6 = vst [vmem:[#allocation0] sm:$0x3] %v5_v0 }
   0x9   :  { %v10_v1 = vld [vmem:[#allocation0] sm:$0x3]  }
   0xa   :  { %v22_v2 = vld [vmem:[#allocation0] sm:$0x3]   ;;  %11 = vrot.lane.b32.xlu0 %v10_v1, %s34_s0 }
   0xb   :  { %23 = vrot.lane.b32.xlu1 %v22_v2, %s35_s8  ;;  %v7_v3 = vld [vmem:[#allocation0] sm:$0x3]  }
   0xc   :  { %v16_v4 = vld [vmem:[#allocation0] sm:$0x3]   ;;  %9 = vst.msk [vmem:[%s63_s1] ss:$4 sm:$0x3] %vm8_vm0, %v7_v3  }
   0xe   :  { %17 = vrot.lane.b32.xlu0 %v16_v4, %s36_s11 }
  0x7c   :  { %v12_v5 = vpop.permute.xlu0 %11  }
  0x7d   :  { %v24_v6 = vpop.permute.xlu1 %23   ;;  %28 = vst.msk [vmem:[%s63_s1 + $0x1] ss:$4 sm:$0x3] %vm8_vm0, %v12_v5  }
  0x7e   :  { %30 = vst.msk [vmem:[%s63_s1 + $0x3] ss:$4 sm:$0x3] %vm8_vm0, %v24_v6  }
  0x80   :  { %v18_v7 = vpop.permute.xlu0 %17  }
  0x81   :  { %29 = vst.msk [vmem:[%s63_s1 + $0x2] ss:$4 sm:$0x3] %vm8_vm0, %v18_v7  }

// kernel: tile.18
= control target key start
LH: loop header
LB: loop body
LE: loop exit
PB: predicated region body
PF: predicated region fallthrough
CT: control target
= control target key end

     0   :  { %s22_s0 = inlined_call_operand.vmem [shape: f32[4], index: 0, kind: input, shape index: {}]   ;;  %s23_s1 = inlined_call_operand.vmem [shape: f32[2,4], index: 1, kind: output, shape index: {}]  }
   0x1   :  { %v4_v0 = vld [vmem:[%s22_s0] ss:$0 sm:$0xff] }
   0x2   :  { %5 = vst [vmem:[%s23_s1] sm:$0x3] %v4_v0 }

// kernel: batch_norm_act.1
= control target key start
LH: loop header
LB: loop body
LE: loop exit
PB: predicated region body
PF: predicated region fallthrough
CT: control target
= control target key end

     0   :  { %v112_v0 = vmov 0   ;;  %s235_s1 = inlined_call_operand.vmem [shape: f32[8,1], index: 1, kind: input, shape index: {}]   ;;  %s236_s2 = inlined_call_operand.vmem [shape: f32[8,1], index: 2, kind: input, shape index: {}]   ;;  %s237_s0 = inlined_call_operand.vmem [shape: f32[8,2048], index: 0, kind: input, shape index: {}]   ;;  %s238_s3 = inlined_call_operand.vmem [shape: f32[8,2048], index: 3, kind: output, shape index: {}]  }
   0x1   :  { %111 = vset.pattern.permute.xlu0 %v112_v0  ;;  %v30_v1 = vld [vmem:[%s235_s1] sm:$0xff]  ;;  %v15_v4 = vld [vmem:[%s237_s0 + $0x8] sm:$0xff]  ;;  %v16_v5 = vld [vmem:[%s237_s0 + $0x10] sm:$0xff] }
   0x2   :  { %33 = vperm.xlu0 %111, %v30_v1   ;;  %v52_v2 = vld [vmem:[%s236_s2] sm:$0xff]  ;;  %v17_v6 = vld [vmem:[%s237_s0 + $0x18] sm:$0xff]  ;;  %v19_v8 = vld [vmem:[%s237_s0 + $0x28] sm:$0xff] }
   0x3   :  { %v14_v3 = vld [vmem:[%s237_s0] sm:$0xff]  ;;  %v20_v9 = vld [vmem:[%s237_s0 + $0x30] sm:$0xff]  ;;  %v21_v10 = vld [vmem:[%s237_s0 + $0x38] sm:$0xff] }
   0x4   :  { %v18_v7 = vld [vmem:[%s237_s0 + $0x20] sm:$0xff]  ;;  %v23_v12 = vld [vmem:[%s237_s0 + $0x48] sm:$0xff]  ;;  %v24_v14 = vld [vmem:[%s237_s0 + $0x50] sm:$0xff] }
   0x5   :  { %v22_v11 = vld [vmem:[%s237_s0 + $0x40] sm:$0xff]  ;;  %v25_v15 = vld [vmem:[%s237_s0 + $0x58] sm:$0xff]  ;;  %v27_v17 = vld [vmem:[%s237_s0 + $0x68] sm:$0xff] }
   0x6   :  { %55 = vperm.xlu0 %111, %v52_v2   ;;  %v26_v16 = vld [vmem:[%s237_s0 + $0x60] sm:$0xff]  ;;  %v28_v18 = vld [vmem:[%s237_s0 + $0x70] sm:$0xff]  ;;  %v29_v19 = vld [vmem:[%s237_s0 + $0x78] sm:$0xff] }
  0x7d   :  { %v34_v13 = vpop.permute.xlu0 %33 }
  0x7e   :  { %v36_v20 = vmul.f32 %v34_v13, %v14_v3  ;;  %v37_v21 = vmul.f32 %v34_v13, %v15_v4  ;;  %v38_v22 = vmul.f32 %v34_v13, %v16_v5  ;;  %v39_v23 = vmul.f32 %v34_v13, %v17_v6 }
  0x7f   :  { %v40_v24 = vmul.f32 %v34_v13, %v18_v7  ;;  %v41_v25 = vmul.f32 %v34_v13, %v19_v8  ;;  %v42_v26 = vmul.f32 %v34_v13, %v20_v9  ;;  %v43_v27 = vmul.f32 %v34_v13, %v21_v10 }
  0x80   :  { %v44_v28 = vmul.f32 %v34_v13, %v22_v11  ;;  %v45_v29 = vmul.f32 %v34_v13, %v23_v12  ;;  %v46_v30 = vmul.f32 %v34_v13, %v24_v14  ;;  %v47_v31 = vmul.f32 %v34_v13, %v25_v15 }
  0x81   :  { %v56_v32 = vpop.permute.xlu0 %55  ;;  %v48_v33 = vmul.f32 %v34_v13, %v26_v16  ;;  %v49_v34 = vmul.f32 %v34_v13, %v27_v17  ;;  %v50_v35 = vmul.f32 %v34_v13, %v28_v18  ;;  %v51_v36 = vmul.f32 %v34_v13, %v29_v19 }
  0x82   :  { %v58_v37 = vadd.f32 %v56_v32, %v36_v20  ;;  %v59_v38 = vadd.f32 %v56_v32, %v37_v21  ;;  %v60_v39 = vadd.f32 %v56_v32, %v38_v22  ;;  %v61_v40 = vadd.f32 %v56_v32, %v39_v23 }
  0x83   :  { %v62_v41 = vadd.f32 %v56_v32, %v40_v24  ;;  %v63_v42 = vadd.f32 %v56_v32, %v41_v25  ;;  %v64_v43 = vadd.f32 %v56_v32, %v42_v26  ;;  %v65_v44 = vadd.f32 %v56_v32, %v43_v27 }
  0x84   :  { %v66_v45 = vadd.f32 %v56_v32, %v44_v28  ;;  %v67_v46 = vadd.f32 %v56_v32, %v45_v29  ;;  %v68_v47 = vadd.f32 %v56_v32, %v46_v30  ;;  %v69_v48 = vadd.f32 %v56_v32, %v47_v31 }
  0x85   :  { %v70_v49 = vadd.f32 %v56_v32, %v48_v33  ;;  %v71_v50 = vadd.f32 %v56_v32, %v49_v34  ;;  %v72_v51 = vadd.f32 %v56_v32, %v50_v35  ;;  %v73_v52 = vadd.f32 %v56_v32, %v51_v36 }
  0x86   :  { %v74_v53 = vmax.f32 %v58_v37, 0.0  ;;  %v75_v54 = vmax.f32 %v59_v38, 0.0  ;;  %v76_v55 = vmax.f32 %v60_v39, 0.0  ;;  %v77_v56 = vmax.f32 %v61_v40, 0.0 }
  0x87   :  { %v78_v57 = vmax.f32 %v62_v41, 0.0  ;;  %v79_v58 = vmax.f32 %v63_v42, 0.0  ;;  %v80_v59 = vmax.f32 %v64_v43, 0.0  ;;  %v81_v60 = vmax.f32 %v65_v44, 0.0 }
  0x88   :  { %v82_v61 = vmax.f32 %v66_v45, 0.0  ;;  %v83_v62 = vmax.f32 %v67_v46, 0.0  ;;  %v84_v63 = vmax.f32 %v68_v47, 0.0  ;;  %v85_v0 = vmax.f32 %v69_v48, 0.0  ;;  %90 = vst [vmem:[%s238_s3] sm:$0xff] %v74_v53  ;;  %91 = vst [vmem:[%s238_s3 + $0x8] sm:$0xff] %v75_v54 }
  0x89   :  { %92 = vst [vmem:[%s238_s3 + $0x10] sm:$0xff] %v76_v55  ;;  %93 = vst [vmem:[%s238_s3 + $0x18] sm:$0xff] %v77_v56  ;;  %v86_v1 = vmax.f32 %v70_v49, 0.0  ;;  %v87_v2 = vmax.f32 %v71_v50, 0.0  ;;  %v88_v3 = vmax.f32 %v72_v51, 0.0  ;;  %v89_v4 = vmax.f32 %v73_v52, 0.0 }
  0x8a   :  { %94 = vst [vmem:[%s238_s3 + $0x20] sm:$0xff] %v78_v57  ;;  %95 = vst [vmem:[%s238_s3 + $0x28] sm:$0xff] %v79_v58 }
  0x8b   :  { %96 = vst [vmem:[%s238_s3 + $0x30] sm:$0xff] %v80_v59  ;;  %97 = vst [vmem:[%s238_s3 + $0x38] sm:$0xff] %v81_v60 }
  0x8c   :  { %98 = vst [vmem:[%s238_s3 + $0x40] sm:$0xff] %v82_v61  ;;  %99 = vst [vmem:[%s238_s3 + $0x48] sm:$0xff] %v83_v62 }
  0x8d   :  { %100 = vst [vmem:[%s238_s3 + $0x50] sm:$0xff] %v84_v63  ;;  %101 = vst [vmem:[%s238_s3 + $0x58] sm:$0xff] %v85_v0 }
  0x8e   :  { %102 = vst [vmem:[%s238_s3 + $0x60] sm:$0xff] %v86_v1  ;;  %103 = vst [vmem:[%s238_s3 + $0x68] sm:$0xff] %v87_v2 }
  0x8f   :  { %104 = vst [vmem:[%s238_s3 + $0x70] sm:$0xff] %v88_v3  ;;  %105 = vst [vmem:[%s238_s3 + $0x78] sm:$0xff] %v89_v4 }

</bundles_post_ra>
